<compile_context>
chip_gen: v7x
topology: tpu7x:2x2x1
jax: 0.10.0
libtpu: 0.0.40
codegen_flags: <defaults>
</compile_context>

<pallas_src>
import functools

import jax
import jax.numpy as jnp
from jax.experimental import pallas as pl
from jax.experimental.pallas import tpu as pltpu


def _ntxent_kernel(zis_ref, zjs_ref, o_ref, *, inv_temperature, batch_size):
    # zis_ref / zjs_ref : (1, B, D) — one loss instance, lane-dense D
    # o_ref             : (1, 1, 1) — per-instance scalar loss
    B = batch_size
    zis = zis_ref[0].astype(jnp.float32)          # [B, D]
    zjs = zjs_ref[0].astype(jnp.float32)          # [B, D]

    # F.normalize(p=2, dim=-1): x / max(||x||, 1e-12) == x * rsqrt(max(||x||^2, 1e-24))
    eps2 = jnp.float32(1e-24)
    inv_i = jax.lax.rsqrt(jnp.maximum(jnp.sum(zis * zis, axis=-1, keepdims=True), eps2))
    inv_j = jax.lax.rsqrt(jnp.maximum(jnp.sum(zjs * zjs, axis=-1, keepdims=True), eps2))
    # Fold 1/temperature into the zis row scale: (zis1/T) @ zjs1.T == sim / T.
    zis1 = zis * (inv_i * jnp.float32(inv_temperature))   # rows already carry 1/T
    zjs1 = zjs * inv_j

    # sim[i, j] = <zis1[i], zjs1[j]>  (already / T) — single MXU pass, contracting
    # the last dims directly (no explicit transpose of zjs1).
    sim = jax.lax.dot_general(
        zis1, zjs1, (((1,), (1,)), ((), ())),
        preferred_element_type=jnp.float32)                              # [B, B]

    # positives (already / T), computed elementwise on the VPU — no diag mask.
    pos_col = jnp.sum(zis1 * zjs1, axis=-1, keepdims=True)               # [B, 1]
    exp_pos_col = jnp.exp(pos_col)                                       # [B, 1]

    exp_sim = jnp.exp(sim)                                               # [B, B]
    # S[i] = sum_{k != i} exp(sim[i, k]/T) = rowsum(exp_sim) - exp(pos_i)
    neg_sum = jnp.sum(exp_sim, axis=-1, keepdims=True) - exp_pos_col     # [B, 1]

    # pos as a [1, B] row for the torch-style broadcast: single masked diag extract.
    rr = jax.lax.broadcasted_iota(jnp.int32, (B, B), 0)
    cc = jax.lax.broadcasted_iota(jnp.int32, (B, B), 1)
    pos_row = jnp.sum(jnp.where(rr == cc, sim, 0.0), axis=0, keepdims=True)  # [1, B]

    # PyTorch broadcasting quirk reproduced exactly:
    #   loss[i, j] = -log( exp(pos[j]) / (exp(pos[j]) + S[i]) )
    #              =  log( exp(pos[j]) + S[i] ) - pos[j]
    denom = jnp.exp(pos_row) + neg_sum                                   # [B, B]
    total = jnp.sum(jnp.log(denom), axis=1, keepdims=True)               # [B, 1]
    total = jnp.sum(total, axis=0, keepdims=True)                        # [1, 1]
    total = total - jnp.float32(B) * jnp.sum(pos_row, axis=1, keepdims=True)
    o_ref[0] = (total / jnp.float32(B)).astype(o_ref.dtype)


def _ntxent_batched_impl(zis_flat, zjs_flat, *, temperature):
    """zis_flat / zjs_flat: [G, B, D] (native dtype; upcast happens in-kernel).
    Returns [G] per-instance losses."""
    G, B, D = zis_flat.shape
    kernel = functools.partial(
        _ntxent_kernel, inv_temperature=1.0 / float(temperature), batch_size=B)

    grid_spec = pltpu.PrefetchScalarGridSpec(
        num_scalar_prefetch=0,
        grid=(G,),                                       # one grid step per loss instance
        in_specs=[
            pl.BlockSpec((1, B, D), lambda g: (g, 0, 0)),  # full lane-dense [B, D] slab
            pl.BlockSpec((1, B, D), lambda g: (g, 0, 0)),
        ],
        out_specs=pl.BlockSpec((1, 1, 1), lambda g: (g, 0, 0)),
    )

    # Explicit VMEM budget once the per-instance footprint would exceed the
    # smallest scoped default (16 MiB on v5e): 2 double-buffered inputs + a
    # handful of [B, B] / [B, D] f32 temporaries.
    itemsize = jnp.dtype(zis_flat.dtype).itemsize
    est_bytes = 2 * 2 * B * D * itemsize + 8 * B * B * 4 + 6 * B * D * 4 + (2 << 20)
    params = {"dimension_semantics": ("parallel",)}       # instances are independent
    if est_bytes > (16 << 20):
        params["vmem_limit_bytes"] = int(min(est_bytes, 100 << 20))

    out = pl.pallas_call(
        kernel,
        out_shape=jax.ShapeDtypeStruct((G, 1, 1), jnp.float32),
        grid_spec=grid_spec,
        compiler_params=pltpu.CompilerParams(**params),
    )(zis_flat, zjs_flat)
    return out[:, 0, 0]


def ntxent_loss_forward(zis, zjs, mask, *, temperature, batch_size):
    """Matches NTXentLoss.forward for a single loss instance. `mask` is accepted
    but ignored — the original module overwrites it with (1 - eye(batch_size))."""
    del mask  # unused, per the original module's forward
    B = zis.shape[0]
    assert B == batch_size, "zis leading dim must equal batch_size (as in the module)"
    zis_flat = zis.reshape(1, B, -1)       # no dtype cast: DMA native dtype
    zjs_flat = zjs.reshape(1, B, -1)
    return _ntxent_batched_impl(zis_flat, zjs_flat, temperature=temperature)[0]


def ntxent_loss_forward_batched(zis_stack, zjs_stack, *, temperature):
    """Batched entry point: [G, B, ...] -> [G] losses in a single kernel launch.
    Amortizes launch/DMA overhead across instances (the dominant cost at B=8)."""
    G, B = zis_stack.shape[0], zis_stack.shape[1]
    zis_flat = zis_stack.reshape(G, B, -1)
    zjs_flat = zjs_stack.reshape(G, B, -1)
    return _ntxent_batched_impl(zis_flat, zjs_flat, temperature=temperature)


def ntxent_loss_reference(zis, zjs, temperature):
    """Plain-JAX reference mirroring the PyTorch forward (incl. broadcasting)."""
    B = zis.shape[0]
    zis = zis.reshape(B, -1).astype(jnp.float32)
    zjs = zjs.reshape(B, -1).astype(jnp.float32)

    def l2norm(x):
        n = jnp.sqrt(jnp.sum(x * x, axis=-1, keepdims=True))
        return x / jnp.maximum(n, 1e-12)

    sim = l2norm(zis) @ l2norm(zjs).T                            # [B, B]
    pos = jnp.diag(sim) / temperature                            # [B]
    off_diag = ~jnp.eye(B, dtype=bool)
    # negatives = sim[mask].view(B, B-1): row-major, so each row keeps its own
    # off-diagonal entries -> row-sum below is identical to the torch code.
    neg_sum = jnp.sum(jnp.where(off_diag, jnp.exp(sim / temperature), 0.0),
                      axis=-1, keepdims=True)                    # [B, 1]
    frac = jnp.exp(pos)[None, :] / (jnp.exp(pos)[None, :] + neg_sum)  # [B, B] (torch broadcast)
    return jnp.sum(-jnp.log(frac)) / B


if __name__ == "__main__":
    # Small shapes consistent with the module: batch=8, channels=4, hidden=32
    # -> flattened feature dim D = 128 (lane-dense).
    B, C, H = 8, 4, 32
    temperature = 0.5

    key = jax.random.PRNGKey(0)
    ki, kj = jax.random.split(key)
    zis = jax.random.normal(ki, (B, C, H), dtype=jnp.float32)
    zjs = jax.random.normal(kj, (B, C, H), dtype=jnp.float32)
    mask = (1.0 - jnp.eye(B)).astype(bool)   # ignored by the module's forward

    loss = ntxent_loss_forward(zis, zjs, mask, temperature=temperature, batch_size=B)
    loss = jax.block_until_ready(loss)
    ref = ntxent_loss_reference(zis, zjs, temperature)
    assert jnp.isfinite(loss)
    assert jnp.allclose(loss, ref, atol=1e-5, rtol=1e-5), (float(loss), float(ref))

    # Batched path: several independent loss instances in ONE launch (parallel
    # grid axis -> both v7x TensorCores; launch/DMA overhead amortized).
    G = 4
    kb0, kb1 = jax.random.split(jax.random.PRNGKey(1))
    zis_b = jax.random.normal(kb0, (G, B, C, H), dtype=jnp.float32)
    zjs_b = jax.random.normal(kb1, (G, B, C, H), dtype=jnp.float32)
    losses = jax.block_until_ready(
        ntxent_loss_forward_batched(zis_b, zjs_b, temperature=temperature))
    refs = jnp.stack([ntxent_loss_reference(zis_b[g], zjs_b[g], temperature)
                      for g in range(G)])
    assert losses.shape == (G,)
    assert jnp.allclose(losses, refs, atol=1e-5, rtol=1e-5), (losses, refs)

    print("KERNEL_OK")
</pallas_src>

<mosaic_0001>
module attributes {stable_mosaic.version = 11 : i64} {
  func.func @_ntxent_kernel(%arg0: i32, %arg1: memref<1x8x128xf32, #tpu.memory_space<vmem>>, %arg2: memref<1x8x128xf32, #tpu.memory_space<vmem>>, %arg3: memref<1x1x1xf32, #tpu.memory_space<vmem>>) attributes {dimension_semantics = [#tpu.dimension_semantics<parallel>], iteration_bounds = array<i64: 1>, scalar_prefetch = 0 : i64, scratch_operands = 0 : i64, tpu.core_type = #tpu.core_type<tc>, window_params = [{transform_indices = @transform_0, window_bounds = array<i64: 1, 8, 128>}, {transform_indices = @transform_1, window_bounds = array<i64: 1, 8, 128>}, {transform_indices = @transform_2, window_bounds = array<i64: 1, 1, 1>}]} {
    %c0 = arith.constant 0 : index
    %c0_0 = arith.constant 0 : index
    %c0_1 = arith.constant 0 : index
    %0 = vector.load %arg1[%c0, %c0_0, %c0_1] : memref<1x8x128xf32, #tpu.memory_space<vmem>>, vector<1x8x128xf32>
    %1 = vector.shape_cast %0 : vector<1x8x128xf32> to vector<8x128xf32>
    %c0_2 = arith.constant 0 : index
    %c0_3 = arith.constant 0 : index
    %c0_4 = arith.constant 0 : index
    %2 = vector.load %arg2[%c0_2, %c0_3, %c0_4] : memref<1x8x128xf32, #tpu.memory_space<vmem>>, vector<1x8x128xf32>
    %3 = vector.shape_cast %2 : vector<1x8x128xf32> to vector<8x128xf32>
    %4 = arith.mulf %1, %1 : vector<8x128xf32>
    %cst = arith.constant dense<0.000000e+00> : vector<8xf32>
    %5 = vector.multi_reduction <add>, %4, %cst [1] : vector<8x128xf32> to vector<8xf32>
    %6 = vector.shape_cast %5 : vector<8xf32> to vector<8x1xf32>
    %cst_5 = arith.constant 1.000000e-24 : f32
    %7 = vector.broadcast %cst_5 : f32 to vector<8x1xf32>
    %8 = arith.maximumf %6, %7 : vector<8x1xf32>
    %9 = math.rsqrt %8 : vector<8x1xf32>
    %10 = arith.mulf %3, %3 : vector<8x128xf32>
    %cst_6 = arith.constant dense<0.000000e+00> : vector<8xf32>
    %11 = vector.multi_reduction <add>, %10, %cst_6 [1] : vector<8x128xf32> to vector<8xf32>
    %12 = vector.shape_cast %11 : vector<8xf32> to vector<8x1xf32>
    %cst_7 = arith.constant 1.000000e-24 : f32
    %13 = vector.broadcast %cst_7 : f32 to vector<8x1xf32>
    %14 = arith.maximumf %12, %13 : vector<8x1xf32>
    %15 = math.rsqrt %14 : vector<8x1xf32>
    %cst_8 = arith.constant 2.000000e+00 : f32
    %16 = vector.broadcast %cst_8 : f32 to vector<8x1xf32>
    %17 = arith.mulf %9, %16 : vector<8x1xf32>
    %18 = vector.broadcast %17 : vector<8x1xf32> to vector<8x128xf32>
    %19 = arith.mulf %1, %18 : vector<8x128xf32>
    %20 = vector.broadcast %15 : vector<8x1xf32> to vector<8x128xf32>
    %21 = arith.mulf %3, %20 : vector<8x128xf32>
    %cst_9 = arith.constant dense<0.000000e+00> : vector<8x8xf32>
    %22 = tpu.matmul %19, %21, %cst_9 {dimension_numbers = #tpu.dot_dimension_numbers<[1], [1], [0], [0], [0, 0, 1, 0], [], []>} : vector<8x128xf32>, vector<8x128xf32>, vector<8x8xf32> -> vector<8x8xf32>
    %23 = arith.mulf %19, %21 : vector<8x128xf32>
    %cst_10 = arith.constant dense<0.000000e+00> : vector<8xf32>
    %24 = vector.multi_reduction <add>, %23, %cst_10 [1] : vector<8x128xf32> to vector<8xf32>
    %25 = vector.shape_cast %24 : vector<8xf32> to vector<8x1xf32>
    %26 = math.exp %25 : vector<8x1xf32>
    %27 = math.exp %22 : vector<8x8xf32>
    %cst_11 = arith.constant dense<0.000000e+00> : vector<8xf32>
    %28 = vector.multi_reduction <add>, %27, %cst_11 [1] : vector<8x8xf32> to vector<8xf32>
    %29 = vector.shape_cast %28 : vector<8xf32> to vector<8x1xf32>
    %30 = arith.subf %29, %26 : vector<8x1xf32>
    %31 = tpu.iota {dimensions = array<i32: 0>} : vector<8x8xi32>
    %32 = tpu.iota {dimensions = array<i32: 1>} : vector<8x8xi32>
    %33 = arith.cmpi eq, %31, %32 : vector<8x8xi32>
    %cst_12 = arith.constant 0.000000e+00 : f32
    %34 = vector.broadcast %cst_12 : f32 to vector<8x8xf32>
    %35 = arith.select %33, %22, %34 : vector<8x8xi1>, vector<8x8xf32>
    %cst_13 = arith.constant dense<0.000000e+00> : vector<8xf32>
    %36 = vector.multi_reduction <add>, %35, %cst_13 [0] : vector<8x8xf32> to vector<8xf32>
    %37 = vector.shape_cast %36 : vector<8xf32> to vector<1x8xf32>
    %38 = math.exp %37 : vector<1x8xf32>
    %39 = vector.broadcast %38 : vector<1x8xf32> to vector<8x8xf32>
    %40 = vector.broadcast %30 : vector<8x1xf32> to vector<8x8xf32>
    %41 = arith.addf %39, %40 : vector<8x8xf32>
    %42 = math.log %41 : vector<8x8xf32>
    %cst_14 = arith.constant dense<0.000000e+00> : vector<8xf32>
    %43 = vector.multi_reduction <add>, %42, %cst_14 [1] : vector<8x8xf32> to vector<8xf32>
    %44 = vector.shape_cast %43 : vector<8xf32> to vector<8x1xf32>
    %cst_15 = arith.constant dense<0.000000e+00> : vector<1xf32>
    %45 = vector.multi_reduction <add>, %44, %cst_15 [0] : vector<8x1xf32> to vector<1xf32>
    %46 = vector.shape_cast %45 : vector<1xf32> to vector<1x1xf32>
    %cst_16 = arith.constant dense<0.000000e+00> : vector<1xf32>
    %47 = vector.multi_reduction <add>, %37, %cst_16 [1] : vector<1x8xf32> to vector<1xf32>
    %48 = vector.shape_cast %47 : vector<1xf32> to vector<1x1xf32>
    %cst_17 = arith.constant 8.000000e+00 : f32
    %49 = vector.broadcast %cst_17 : f32 to vector<1x1xf32>
    %50 = arith.mulf %49, %48 : vector<1x1xf32>
    %51 = arith.subf %46, %50 : vector<1x1xf32>
    %cst_18 = arith.constant 8.000000e+00 : f32
    %52 = vector.broadcast %cst_18 : f32 to vector<1x1xf32>
    %53 = arith.divf %51, %52 : vector<1x1xf32>
    %c0_19 = arith.constant 0 : index
    %c0_20 = arith.constant 0 : index
    %c0_21 = arith.constant 0 : index
    %54 = vector.load %arg3[%c0_19, %c0_20, %c0_21] : memref<1x1x1xf32, #tpu.memory_space<vmem>>, vector<1x1x1xf32>
    %55 = vector.shape_cast %54 : vector<1x1x1xf32> to vector<1x1xf32>
    %56 = vector.shape_cast %53 : vector<1x1xf32> to vector<1x1x1xf32>
    tpu.vector_store %arg3[%c0_19, %c0_20, %c0_21], %56 {strides = array<i32>} : memref<1x1x1xf32, #tpu.memory_space<vmem>>, vector<1x1x1xf32>,
    return
  }
  func.func @transform_0(%arg0: i32) -> (i32, i32, i32) {
    %c0_i32 = arith.constant 0 : i32
    %c0_i32_0 = arith.constant 0 : i32
    %c0_i32_1 = arith.constant 0 : i32
    return %arg0, %c0_i32, %c0_i32_0 : i32, i32, i32
  }
  func.func @transform_1(%arg0: i32) -> (i32, i32, i32) {
    %c0_i32 = arith.constant 0 : i32
    %c0_i32_0 = arith.constant 0 : i32
    %c0_i32_1 = arith.constant 0 : i32
    return %arg0, %c0_i32, %c0_i32_0 : i32, i32, i32
  }
  func.func @transform_2(%arg0: i32) -> (i32, i32, i32) {
    %c0_i32 = arith.constant 0 : i32
    %c0_i32_0 = arith.constant 0 : i32
    %c0_i32_1 = arith.constant 0 : i32
    return %arg0, %c0_i32, %c0_i32_0 : i32, i32, i32
  }
}

</mosaic_0001>

<bundles_post_ra>
// kernel: tpu_custom_call.1
= control target key start
LH: loop header
LB: loop body
LE: loop exit
PB: predicated region body
PF: predicated region fallthrough
CT: control target
= control target key end

     0   :  { %7 = vsyncpa [#allocation3], 0  ;;  %s341_s0 = inlined_call_operand.hbm [shape: f32[1,8,128], index: 0, kind: input, shape index: {}]   ;;  %s342_s1 = inlined_call_operand.hbm [shape: f32[1,8,128], index: 1, kind: input, shape index: {}]   ;;  %s343_s2 = inlined_call_operand.hbm [shape: f32[1,1,1], index: 2, kind: output, shape index: {}]  }
   0x1   :  { %8 = vsyncpa [#allocation6], 0 }
   0x2   :  { %9 = vsyncpa [#allocation4], 0  ;;  %s281_s9 = smov [#allocation2]   ;;  %s282_s11 = smov [#allocation5]  }
   0x3   :  { %s16_s10 = sshll.u32 %s281_s9, 4  ;;  %s26_s12 = sshll.u32 %s282_s11, 4  ;;  %s17_s10 = int_to_ptr.vmem [resolvable:$true] %s16_s10  ;;  %s27_s12 = int_to_ptr.vmem [resolvable:$true] %s26_s12 }
   0x4   :  { %s209_s15 = scalar_lea.hbm %s341_s0, 128 }
   0x5   :  { %p210_p0 = scmp.ne.s32.totalorder %s341_s0, %s209_s15  ;;  %p213_p1 = scmp.lt.u32.totalorder %s209_s15, %s341_s0 }
   0x7   :  { %p215_p2 = pnand %p213_p1, %p210_p0 }
   0x9   :  { %218 = shalt.err (!%p215_p2)
}
   0xa   :  { %s219_s20 = scalar_lea.vmem %s17_s10, 128  ;;  %p224_p4 = scmp.lt.s32.totalorder %s17_s10, %s17_s10 }
   0xb   :  { %p220_p3 = scmp.ne.s32.totalorder %s17_s10, %s219_s20  ;;  %p225_p5 = scmp.lt.s32.totalorder %s219_s20, %s219_s20 }
   0xd   :  { %p226_p6 = por %p225_p5, %p224_p4 }
   0xf   :  { %p227_p7 = pnand %p226_p6, %p220_p3 }
  0x11   :  { %230 = shalt.err (!%p227_p7)
}
  0x12   :  { %19 = dma.hbm_to_vmem [thread:$0]  %s341_s0, 128, %s17_s10, [#allocation3]  }
  0x13   :  { %s231_s25 = scalar_lea.hbm %s342_s1, 128 }
  0x14   :  { %p232_p8 = scmp.ne.s32.totalorder %s342_s1, %s231_s25  ;;  %p235_p9 = scmp.lt.u32.totalorder %s231_s25, %s342_s1 }
  0x16   :  { %p237_p10 = pnand %p235_p9, %p232_p8 }
  0x18   :  { %240 = shalt.err (!%p237_p10)
}
  0x19   :  { %s241_s30 = scalar_lea.vmem %s27_s12, 128  ;;  %p246_p12 = scmp.lt.s32.totalorder %s27_s12, %s27_s12 }
  0x1a   :  { %p242_p11 = scmp.ne.s32.totalorder %s27_s12, %s241_s30  ;;  %p247_p13 = scmp.lt.s32.totalorder %s241_s30, %s241_s30 }
  0x1c   :  { %p248_p0 = por %p247_p13, %p246_p12 }
  0x1e   :  { %p249_p1 = pnand %p248_p0, %p242_p11 }
  0x20   :  { %252 = shalt.err (!%p249_p1)
}
  0x21   :  { %29 = dma.hbm_to_vmem [thread:$0]  %s342_s1, 128, %s27_s12, [#allocation6]  }
  0x22   :  { %275 = dma.done.wait [#allocation3], 128  }
  0x23   :  { %276 = vsyncadd [#allocation3], 4294967168 }
  0x24   :  { %277 = dma.done.wait [#allocation6], 128  }
  0x25   :  { %278 = vsyncadd [#allocation6], 4294967168  ;;  %v37_v0 = vld [vmem:[#allocation5] sm:$0xff]  ;;  %v36_v1 = vld [vmem:[#allocation2] sm:$0xff]  ;;  %v283_v4 = vmov 0.0   ;;  %vm284_vm0 = vmmov 0   ;;  %v133_v15 = vlaneseq }
  0x26   :  { %v43_v2 = vmul.f32 %v37_v0, %v37_v0  ;;  %v38_v3 = vmul.f32 %v36_v1, %v36_v1  ;;  %187 = vmatprep.subr.mxu0 %v283_v4  ;;  %189 = vmatprep.mubr.msk.f32.mxu0 %vm284_vm0, %v283_v4  ;;  %vm128_vm2 = vcmask 64512   ;;  %s285_s1 = smov [#allocation7]   ;;  %vm167_vm3 = vcmask 0  }
  0x27   :  { %v134_v16 = vshrl.u32 %v133_v15, 7  ;;  %v136_v17 = vand.u32 127, %v133_v15  ;;  %s175_s4 = sshll.u32 %s285_s1, 4  ;;  %s176_s4 = int_to_ptr.vmem [resolvable:$true] %s175_s4 }
  0x28   :  { %44 = vadd.xlane.f32.xlu0 %v43_v2  ;;  %s253_s5 = scalar_lea.vmem %s176_s4, 16  ;;  %s257_s6 = scalar_lea.vmem %s176_s4, 32 }
  0x29   :  { %vm137_vm1 = vcmp.eq.s32.totalorder %v134_v16, %v136_v17  ;;  %p254_p2 = scmp.ne.s32.totalorder %s176_s4, %s253_s5  ;;  %p258_p3 = scmp.lt.s32.totalorder %s176_s4, %s176_s4 }
  0x2a   :  { %p259_p4 = scmp.lt.s32.totalorder %s257_s6, %s253_s5 }
  0x2c   :  { %39 = vadd.xlane.f32.xlu0 %v38_v3  ;;  %p260_p5 = por %p259_p4, %p258_p3 }
  0x2e   :  { %p261_p6 = pnand %p260_p5, %p254_p2 }
  0xb5   :  { %v45_v5 = vpop.xlane.xlu0 %44 }
  0xb6   :  { %v46_v6 = vmax.f32 %v45_v5, 1e-24 }
  0xb8   :  { %197 = vrsqrt.f32 %v46_v6 }
  0xb9   :  { %v40_v7 = vpop.xlane.xlu0 %39 }
  0xba   :  { %v41_v8 = vmax.f32 %v40_v7, 1e-24 }
  0xbc   :  { %199 = vrsqrt.f32 %v41_v8 }
  0xc2   :  { %v198_v9 = vpop.eup %197 }
  0xc3   :  { %v50_v10 = vmul.f32 %v198_v9, %v37_v0 }
  0xc5   :  { %188 = vmatpush3.xpose.msra.mxu0 %v50_v10 }
  0xc6   :  { %v200_v11 = vpop.eup %199 }
  0xc7   :  { %v48_v12 = vmul.f32 2.0, %v200_v11 }
  0xc9   :  { %v49_v13 = vmul.f32 %v48_v12, %v36_v1 }
  0xcb   :  { %190 = vmatmul.mubr.f32.vlgmr.msra.gmra.mrb[0].mxu0 %v49_v13  ;;  %v121_v14 = vmul.f32 %v50_v10, %v49_v13 }
  0xcd   :  { %122 = vadd.xlane.f32.xlu1 %v121_v14 }
 0x15a   :  { %v123_v32 = vpop.xlane.xlu1 %122 }
 0x15b   :  { %v124_v33 = vmul.f32 1.442695, %v123_v32 }
 0x19e   :  { %v117_v18 = vpop.f32.mrb[0].mxu0 }
 0x19f   :  { %v126_v19 = vmul.f32 1.442695, %v117_v18  ;;  %v138_v20 = vsel %vm137_vm1, %v117_v18, 0.0  ;;  %v191_v21 = vpop.f32.mrb[1].mxu0 }
 0x1a0   :  { %v139_v22 = vsel %vm128_vm2, %v138_v20, 0.0 }
 0x1a1   :  { %201 = vpow2.f32 %v126_v19  ;;  %v140_v23 = vrot.slane %v139_v22, 4 }
 0x1a2   :  { %203 = vpow2.f32 %v124_v33 }
 0x1a3   :  { %v141_v24 = vadd.f32 %v140_v23, %v139_v22 }
 0x1a5   :  { %v142_v25 = vrot.slane %v141_v24, 2 }
 0x1a7   :  { %v143_v26 = vadd.f32 %v142_v25, %v141_v24 }
 0x1a9   :  { %v144_v27 = vrot.slane %v143_v26, 1 }
 0x1ab   :  { %v202_v28 = vpop.eup %201  ;;  %v145_v30 = vadd.f32 %v144_v27, %v143_v26 }
 0x1ac   :  { %v129_v29 = vsel %vm128_vm2, %v202_v28, 0.0  ;;  %v204_v35 = vpop.eup %203 }
 0x1ad   :  { %130 = vadd.xlane.f32.xlu1 %v129_v29  ;;  %v160_v31 = vsel %vm128_vm2, %v145_v30, 0.0  ;;  %v146_v34 = vmul.f32 1.442695, %v145_v30 }
 0x1af   :  { %205 = vpow2.f32 %v146_v34 }
 0x1b1   :  { %161 = vadd.xlane.f32.xlu1 %v160_v31 }
 0x1b9   :  { %v206_v38 = vpop.eup %205 }
 0x23a   :  { %v131_v36 = vpop.xlane.xlu1 %130 }
 0x23b   :  { %v132_v37 = vsub.f32 %v131_v36, %v204_v35 }
 0x23d   :  { %v148_v39 = vadd.f32 %v206_v38, %v132_v37 }
 0x23e   :  { %v162_v48 = vpop.xlane.xlu1 %161 }
 0x23f   :  { %207 = vlog2.f32 %v148_v39  ;;  %v163_v50 = vmul.f32 8.0, %v162_v48 }
 0x249   :  { %v208_v40 = vpop.eup %207 }
 0x24a   :  { %v150_v41 = vmul.f32 0.6931472, %v208_v40 }
 0x24c   :  { %v151_v42 = vsel %vm128_vm2, %v150_v41, 0.0 }
 0x24d   :  { %152 = vadd.xlane.f32.xlu0 %v151_v42 }
 0x2da   :  { %v153_v43 = vpop.xlane.xlu0 %152 }
 0x2db   :  { %v154_v44 = vrot.slane %v153_v43, 4 }
 0x2dd   :  { %v155_v45 = vadd.f32 %v154_v44, %v153_v43 }
 0x2df   :  { %v156_v46 = vrot.slane %v155_v45, 2 }
 0x2e1   :  { %v157_v47 = vadd.f32 %v156_v46, %v155_v45 }
 0x2e3   :  { %v158_v49 = vrot.slane %v157_v47, 1 }
 0x2e5   :  { %v159_v51 = vadd.f32 %v158_v49, %v157_v47 }
 0x2e7   :  { %v164_v52 = vsub.f32 %v159_v51, %v163_v50 }
 0x2e9   :  { %v166_v53 = vmul.f32 0.125, %v164_v52 }
 0x2eb   :  { %168 = vst.msk [vmem:[#allocation7] sm:$0x1] %vm167_vm3, %v166_v53 }
 0x2ec   :  { %264 = shalt.err (!%p261_p6)
}
 0x2ed   :  { %s265_s9 = scalar_lea.hbm %s343_s2, 16 }
 0x2ee   :  { %p266_p7 = scmp.ne.s32.totalorder %s343_s2, %s265_s9  ;;  %p269_p8 = scmp.lt.u32.totalorder %s265_s9, %s343_s2 }
 0x2f0   :  { %p271_p9 = pnand %p269_p8, %p266_p7 }
 0x2f2   :  { %274 = shalt.err (!%p271_p9)
}
 0x2f3   :  { %178 = dma.vmem_to_hbm [thread:$0]  %s176_s4, 16, %s343_s2, [#allocation4]  }
 0x2f4   :  { %279 = dma.done.wait [#allocation4], 16  }
 0x2f5   :  { %280 = vsyncadd [#allocation4], 4294967280 }
 0x2f6   :  { %182 = vsyncpa [#allocation3], 1 }
 0x2f7   :  { %183 = vsyncpa [#allocation6], 1 }
 0x2f8   :  { %184 = vsyncpa [#allocation4], 1 }

</bundles_post_ra>
